<compile_context>
chip_gen: v6e
topology: v6e:2x2x1
jax: 0.10.0
libtpu: 0.0.40
codegen_flags: <defaults>
</compile_context>

<pallas_src>
import functools

import jax
import jax.numpy as jnp
from jax import lax
from jax.experimental import pallas as pl
from jax.experimental.pallas import tpu as pltpu


def _round_up(x, m):
    return (x + m - 1) // m * m


def _pick_row_tile(batch, h, w, target_m=2048):
    """Largest row tile TH with H % TH == 0 and TH*W a multiple of 128, capped
    so M = TH*W <= target_m.  Falls back to TH = H (single tile, block = full
    array dim, so the 128-multiple requirement is waived).  If batch == 1,
    prefer a tiling that keeps >= 2 grid steps for v7x's two TensorCores."""
    cands = [th for th in range(1, h + 1)
             if h % th == 0 and (th * w) % 128 == 0 and th * w <= target_m]
    if not cands:
        return h
    th = max(cands)
    if batch == 1 and h // th < 2:
        smaller = [t for t in cands if h // t >= 2]
        if smaller:
            th = max(smaller)
    return th


def dsconv_kernel(x_ref, w_ref, shift_ref, o_ref):
    """One (batch, row-tile) block per grid step.

    x_ref    : (K_p, M)       im2col patches (tap/channel-major K, pixels on lanes)
    w_ref    : (Cout_r, K_p)  fused depthwise * pointwise * BN-scale weights
    shift_ref: (Cout_r, 1)    fused bias / BN shift (f32)
    o_ref    : (Cout_r, M)    channel-major output tile

    Single MXU matmul -> already channel-major output: no in-kernel transpose,
    no per-tap slicing, lane-dense (multiple-of-128) stores.
    """
    acc = jnp.dot(w_ref[...], x_ref[...], preferred_element_type=jnp.float32)
    acc = acc + shift_ref[...]              # (Cout_r, 1) broadcast over M lanes
    o_ref[...] = jnp.maximum(acc, 0.0).astype(o_ref.dtype)


@functools.partial(jax.jit, static_argnames=("compute_dtype",))
def dsconv_pallas(x_nchw, w_dw, b_dw, w_pw, b_pw, gamma, beta, rmean, rvar,
                  *, compute_dtype=jnp.bfloat16):
    eps = 1e-5
    B, Cin, H, W = x_nchw.shape
    Cout = w_pw.shape[0]

    K = 9 * Cin                       # im2col contraction size
    K_p = _round_up(K, 128)           # lane-dense MXU K
    Cout_r = _round_up(Cout, 8)       # output channels live on sublanes: 8 is enough

    TH = _pick_row_tile(B, H, W)      # rows of the image per grid step
    NT = H // TH
    M = TH * W                        # matmul N dim / output lane dim

    # ---- fold parameters (tiny, wrapper-side) ------------------------------
    scale = gamma / jnp.sqrt(rvar + eps)                      # (Cout,)
    wdw = w_dw.reshape(Cin, 9)                                # [c, k], k = dy*3+dx
    wpw = w_pw.reshape(Cout, Cin)                             # [o, c]
    # w_eff[o, k, c] = w_dw[c, k] * w_pw[o, c] * scale[o]
    w_eff = (wdw.T[None, :, :] * wpw[:, None, :]) * scale[:, None, None]
    w_eff = w_eff.reshape(Cout, K)
    w_kernel = jnp.pad(w_eff, ((0, Cout_r - Cout), (0, K_p - K)))
    w_kernel = w_kernel.astype(compute_dtype)
    # shift[o] = scale[o] * ((w_pw @ b_dw)[o] + b_pw[o] - rmean[o]) + beta[o]
    shift = scale * (wpw @ b_dw + b_pw - rmean) + beta
    shift_kernel = jnp.pad(shift, (0, Cout_r - Cout)).reshape(Cout_r, 1)
    shift_kernel = shift_kernel.astype(jnp.float32)

    # ---- im2col: one dense K_p-wide operand per output pixel ---------------
    # Collapses the 3x3 taps into a single MXU contraction; the only padding
    # is 9*Cin -> 128 on K (no Cin->128 lane pad, no halo row duplication of
    # 128-wide channel slabs).
    x_nhwc = jnp.transpose(x_nchw, (0, 2, 3, 1)).astype(compute_dtype)
    xp = jnp.pad(x_nhwc, ((0, 0), (1, 1), (1, 1), (0, 0)))
    taps = [xp[:, dy:dy + H, dx:dx + W, :]
            for dy in range(3) for dx in range(3)]            # 9 x (B,H,W,Cin)
    patches = jnp.stack(taps, axis=3)                         # (B,H,W,9,Cin)
    patches = patches.reshape(B, NT, M, K)                    # row tiles
    patches = jnp.swapaxes(patches, 2, 3)                     # (B,NT,K,M)
    x_kernel = jnp.pad(patches, ((0, 0), (0, 0), (0, K_p - K), (0, 0)))
    # TODO(synk): the wrapper-side im2col still costs one extra XLA HBM pass;
    # an in-kernel halo DMA (memory_space=pl.ANY) would remove it entirely.

    out = pl.pallas_call(
        dsconv_kernel,
        out_shape=jax.ShapeDtypeStruct((B, Cout_r, H * W), jnp.float32),
        grid_spec=pltpu.PrefetchScalarGridSpec(
            num_scalar_prefetch=0,
            grid=(B, NT),
            in_specs=[
                pl.BlockSpec((None, None, K_p, M), lambda b, t: (b, t, 0, 0)),
                # Weight / shift index maps are constant -> fetched once; at
                # these sizes double-buffering them costs only a few KiB.
                # TODO(synk): at large Cin/Cout, add pipeline_mode=pl.Buffered(1)
                # here to hold a single copy of the weight block in VMEM.
                pl.BlockSpec((Cout_r, K_p), lambda b, t: (0, 0)),
                pl.BlockSpec((Cout_r, 1), lambda b, t: (0, 0)),
            ],
            out_specs=pl.BlockSpec((None, Cout_r, M), lambda b, t: (b, 0, t)),
        ),
        compiler_params=pltpu.CompilerParams(
            dimension_semantics=("parallel", "parallel")),
    )(x_kernel, w_kernel, shift_kernel)

    # Output is already channel-major (NCHW-compatible): slice the (at most 7)
    # padded sublane channels and reshape (free).
    return out[:, :Cout, :].reshape(B, Cout, H, W)


def dsconv_reference(x_nchw, w_dw, b_dw, w_pw, b_pw, gamma, beta, rmean, rvar):
    """Pure-JAX reference (NCHW, matching torch semantics, BN in eval mode)."""
    # TODO(synk): BN uses running statistics (eval-mode semantics); training-mode
    # batch statistics are not computed.
    eps = 1e-5
    Cin = x_nchw.shape[1]
    dn = lax.conv_dimension_numbers(x_nchw.shape, w_dw.shape,
                                    ("NCHW", "OIHW", "NCHW"))
    y = lax.conv_general_dilated(x_nchw, w_dw, window_strides=(1, 1),
                                 padding=((1, 1), (1, 1)),
                                 dimension_numbers=dn,
                                 feature_group_count=Cin)
    y = y + b_dw[None, :, None, None]
    dn2 = lax.conv_dimension_numbers(y.shape, w_pw.shape,
                                     ("NCHW", "OIHW", "NCHW"))
    z = lax.conv_general_dilated(y, w_pw, window_strides=(1, 1),
                                 padding=((0, 0), (0, 0)),
                                 dimension_numbers=dn2)
    z = z + b_pw[None, :, None, None]
    z = (z - rmean[None, :, None, None]) / jnp.sqrt(rvar[None, :, None, None] + eps)
    z = z * gamma[None, :, None, None] + beta[None, :, None, None]
    return jnp.maximum(z, 0.0)


if __name__ == "__main__":
    B, Cin, Cout, H, W = 2, 4, 8, 16, 16

    key = jax.random.PRNGKey(0)
    ks = jax.random.split(key, 8)
    x = jax.random.normal(ks[0], (B, Cin, H, W), jnp.float32)

    # deterministic synthetic parameters (shapes match nn.Conv2d / BatchNorm2d)
    w_dw = jax.random.normal(ks[1], (Cin, 1, 3, 3), jnp.float32) * 0.2
    b_dw = jax.random.normal(ks[2], (Cin,), jnp.float32) * 0.1
    w_pw = jax.random.normal(ks[3], (Cout, Cin, 1, 1), jnp.float32) * 0.2
    b_pw = jax.random.normal(ks[4], (Cout,), jnp.float32) * 0.1
    gamma = 1.0 + 0.1 * jax.random.normal(ks[5], (Cout,), jnp.float32)
    beta = 0.1 * jax.random.normal(ks[6], (Cout,), jnp.float32)
    rmean = 0.1 * jax.random.normal(ks[7], (Cout,), jnp.float32)
    rvar = jnp.ones((Cout,), jnp.float32)

    out = dsconv_pallas(x, w_dw, b_dw, w_pw, b_pw, gamma, beta, rmean, rvar)
    out = jax.block_until_ready(out)

    ref = dsconv_reference(x, w_dw, b_dw, w_pw, b_pw, gamma, beta, rmean, rvar)
    assert out.shape == (B, Cout, H, W)
    # bf16 MXU operands (f32 accumulation): tolerance loosened per review.
    assert jnp.allclose(out, ref, atol=2e-2, rtol=2e-2), "mismatch vs reference"

    print("KERNEL_OK")
</pallas_src>

<mosaic_0001>
module attributes {stable_mosaic.version = 11 : i64} {
  func.func @dsconv_kernel(%arg0: i32, %arg1: i32, %arg2: memref<1x1x128x256xbf16, #tpu.memory_space<vmem>>, %arg3: memref<8x128xbf16, #tpu.memory_space<vmem>>, %arg4: memref<8x1xf32, #tpu.memory_space<vmem>>, %arg5: memref<1x8x256xf32, #tpu.memory_space<vmem>>) attributes {dimension_semantics = [#tpu.dimension_semantics<parallel>, #tpu.dimension_semantics<parallel>], iteration_bounds = array<i64: 2, 1>, scalar_prefetch = 0 : i64, scratch_operands = 0 : i64, tpu.core_type = #tpu.core_type<tc>, window_params = [{transform_indices = @transform_0, window_bounds = array<i64: 1, 1, 128, 256>}, {pipeline_mode = #tpu.pipeline_mode<synchronous>, transform_indices = @transform_1, window_bounds = array<i64: 8, 128>}, {pipeline_mode = #tpu.pipeline_mode<synchronous>, transform_indices = @transform_2, window_bounds = array<i64: 8, 1>}, {transform_indices = @transform_3, window_bounds = array<i64: 1, 8, 256>}]} {
    %c0 = arith.constant 0 : index
    %c0_0 = arith.constant 0 : index
    %0 = vector.load %arg3[%c0, %c0_0] : memref<8x128xbf16, #tpu.memory_space<vmem>>, vector<8x128xbf16>
    %c0_1 = arith.constant 0 : index
    %c0_2 = arith.constant 0 : index
    %c0_3 = arith.constant 0 : index
    %c0_4 = arith.constant 0 : index
    %1 = vector.load %arg2[%c0_1, %c0_2, %c0_3, %c0_4] : memref<1x1x128x256xbf16, #tpu.memory_space<vmem>>, vector<1x1x128x256xbf16>
    %2 = vector.shape_cast %1 : vector<1x1x128x256xbf16> to vector<128x256xbf16>
    %cst = arith.constant dense<0.000000e+00> : vector<8x256xf32>
    %3 = tpu.matmul %0, %2, %cst {dimension_numbers = #tpu.dot_dimension_numbers<[1], [0], [0], [1], [0, 0, 1, 1], [], []>} : vector<8x128xbf16>, vector<128x256xbf16>, vector<8x256xf32> -> vector<8x256xf32>
    %c0_5 = arith.constant 0 : index
    %c0_6 = arith.constant 0 : index
    %4 = vector.load %arg4[%c0_5, %c0_6] : memref<8x1xf32, #tpu.memory_space<vmem>>, vector<8x1xf32>
    %5 = vector.broadcast %4 : vector<8x1xf32> to vector<8x256xf32>
    %6 = arith.addf %3, %5 : vector<8x256xf32>
    %cst_7 = arith.constant 0.000000e+00 : f32
    %7 = vector.broadcast %cst_7 : f32 to vector<8x256xf32>
    %8 = arith.maximumf %6, %7 : vector<8x256xf32>
    %c0_8 = arith.constant 0 : index
    %c0_9 = arith.constant 0 : index
    %c0_10 = arith.constant 0 : index
    %9 = vector.load %arg5[%c0_8, %c0_9, %c0_10] : memref<1x8x256xf32, #tpu.memory_space<vmem>>, vector<1x8x256xf32>
    %10 = vector.shape_cast %9 : vector<1x8x256xf32> to vector<8x256xf32>
    %11 = vector.shape_cast %8 : vector<8x256xf32> to vector<1x8x256xf32>
    tpu.vector_store %arg5[%c0_8, %c0_9, %c0_10], %11 {strides = array<i32>} : memref<1x8x256xf32, #tpu.memory_space<vmem>>, vector<1x8x256xf32>,
    return
  }
  func.func @transform_0(%arg0: i32, %arg1: i32) -> (i32, i32, i32, i32) {
    %c0_i32 = arith.constant 0 : i32
    %c0_i32_0 = arith.constant 0 : i32
    %c0_i32_1 = arith.constant 0 : i32
    return %arg0, %arg1, %c0_i32, %c0_i32_0 : i32, i32, i32, i32
  }
  func.func @transform_1(%arg0: i32, %arg1: i32) -> (i32, i32) {
    %c0_i32 = arith.constant 0 : i32
    %c0_i32_0 = arith.constant 0 : i32
    %c0_i32_1 = arith.constant 0 : i32
    return %c0_i32, %c0_i32_0 : i32, i32
  }
  func.func @transform_2(%arg0: i32, %arg1: i32) -> (i32, i32) {
    %c0_i32 = arith.constant 0 : i32
    %c0_i32_0 = arith.constant 0 : i32
    %c0_i32_1 = arith.constant 0 : i32
    return %c0_i32, %c0_i32_0 : i32, i32
  }
  func.func @transform_3(%arg0: i32, %arg1: i32) -> (i32, i32, i32) {
    %c0_i32 = arith.constant 0 : i32
    %c0_i32_0 = arith.constant 0 : i32
    return %arg0, %c0_i32, %arg1 : i32, i32, i32
  }
}

</mosaic_0001>

<bundles_post_ra>
// kernel: dsconv_pallas.1
= control target key start
LH: loop header
LB: loop body
LE: loop exit
PB: predicated region body
PF: predicated region fallthrough
CT: control target
= control target key end

     0   :  { %s571_s12 = smov 0   ;;  %s573_s13 = smov 0   ;;  %s614_s0 = inlined_call_operand.vmem [shape: bf16[2,1,128,256], index: 0, kind: input, shape index: {}]   ;;  %s615_s1 = inlined_call_operand.vmem [shape: bf16[8,128], index: 1, kind: input, shape index: {}]   ;;  %s616_s2 = inlined_call_operand.vmem [shape: f32[8,1], index: 2, kind: input, shape index: {}]   ;;  %s617_s3 = inlined_call_operand.vmem [shape: f32[2,8,256], index: 3, kind: output, shape index: {}]  }
   0x1   :  { %s575_s14 = smov 0  }
   0x2 LB: > { %s25_s15 = sadd.s32 1, %s544_s13  ;;  %p451_p0 = scmp.ge.s32.totalorder %s548_s14, 1  ;;  %s548_s14 = sphi %s575_s14, %s13_s14   ;;  %s544_s13 = sphi %s573_s13, %s619_s13   ;;  %s540_s12 = sphi %s571_s12, %s618_s12  }
   0x3   : > { %p27_p1 = scmp.ge.s32.totalorder %s25_s15, 2  ;;  %p157_p2 = scmp.lt.s32.totalorder %s548_s14, 3 }
   0x5   : > { %s621_s15 = smov (%p27_p1, %s25_s15), 0  ;;  %p158_p3 = pnand %p451_p0, %p157_p2 }
   0x6   : > { %p189_p4 = scmp.lt.s32.totalorder (!%p158_p3), %s540_s12, 1 }
   0x7   : > { %161 = sbr.rel (%p158_p3) target bundleno = 248 (0xf8), region = 32 }
   0xc   : > { %v226_v0 = vld [vmem:[%s616_s2] sm:$0xff]  ;;  %v550_v1 = vmov 0   ;;  %s623_s12 = smov (!%p189_p4, %s540_s12), 1 }
   0xd   : > { %344 = vmatprep.mubr.bf16.mxu0 %v550_v1  ;;  %501 = vset.pattern.permute.xlu0 %v550_v1  ;;  %s474_s18 = sshll.u32 %s623_s12, 7  ;;  %v209_v18 = vld [vmem:[%s615_s1] sm:$0xf]  ;;  %s475_s24 = sshll.u32 %s623_s12, 4 }
   0xe   : > { %229 = vperm.xlu0 %501, %v226_v0   ;;  %s197_s21 = scalar_lea.vmem %s614_s0, %s474_s18  ;;  %s206_s27 = scalar_lea.vmem %s617_s3, %s475_s24 }
   0xf   : > { %v502_v2 = vld [vmem:[%s197_s21 + $0x74] ss:$8 sps:$4 sm:$0xff]   ;;  %v504_v3 = vld [vmem:[%s197_s21 + $0x70] ss:$8 sps:$4 sm:$0xff]   ;;  %v505_v4 = vld [vmem:[%s197_s21 + $0x64] ss:$8 sps:$4 sm:$0xff]  }
  0x10   : > { %312 = vmatprep.subr.bf16.mxu0 %v502_v2  ;;  %v507_v5 = vld [vmem:[%s197_s21 + $0x60] ss:$8 sps:$4 sm:$0xff]   ;;  %v508_v6 = vld [vmem:[%s197_s21 + $0x54] ss:$8 sps:$4 sm:$0xff]   ;;  %v510_v7 = vld [vmem:[%s197_s21 + $0x50] ss:$8 sps:$4 sm:$0xff]  }
  0x11   : > { %313 = vmatpush1.bf16.msra.mxu0 %v504_v3  ;;  %v511_v8 = vld [vmem:[%s197_s21 + $0x44] ss:$8 sps:$4 sm:$0xff]   ;;  %v513_v9 = vld [vmem:[%s197_s21 + $0x40] ss:$8 sps:$4 sm:$0xff]   ;;  %v514_v10 = vld [vmem:[%s197_s21 + $0x34] ss:$8 sps:$4 sm:$0xff]  }
  0x12   : > { %314 = vmatprep.subr.bf16.mxu0 %v505_v4  ;;  %v516_v11 = vld [vmem:[%s197_s21 + $0x30] ss:$8 sps:$4 sm:$0xff]   ;;  %v517_v12 = vld [vmem:[%s197_s21 + $0x24] ss:$8 sps:$4 sm:$0xff]   ;;  %v519_v13 = vld [vmem:[%s197_s21 + $0x20] ss:$8 sps:$4 sm:$0xff]  }
  0x13   : > { %v520_v14 = vld [vmem:[%s197_s21 + $0x14] ss:$8 sps:$4 sm:$0xff]   ;;  %v522_v15 = vld [vmem:[%s197_s21 + $0x10] ss:$8 sps:$4 sm:$0xff]   ;;  %v523_v16 = vld [vmem:[%s197_s21 + $0x4] ss:$8 sps:$4 sm:$0xff]  }
  0x14   : > { %v525_v17 = vld [vmem:[%s197_s21] ss:$8 sps:$4 sm:$0xff]  }
  0x15   : > { %315 = vmatpush1.bf16.msra.mxu0 %v507_v5 }
  0x16   : > { %316 = vmatprep.subr.bf16.mxu0 %v508_v6 }
  0x19   : > { %317 = vmatpush1.bf16.msra.mxu0 %v510_v7 }
  0x1a   : > { %318 = vmatprep.subr.bf16.mxu0 %v511_v8 }
  0x1d   : > { %319 = vmatpush1.bf16.msra.mxu0 %v513_v9 }
  0x1e   : > { %320 = vmatprep.subr.bf16.mxu0 %v514_v10 }
  0x21   : > { %321 = vmatpush1.bf16.msra.mxu0 %v516_v11 }
  0x22   : > { %322 = vmatprep.subr.bf16.mxu0 %v517_v12 }
  0x25   : > { %323 = vmatpush1.bf16.msra.mxu0 %v519_v13 }
  0x26   : > { %324 = vmatprep.subr.bf16.mxu0 %v520_v14 }
  0x29   : > { %325 = vmatpush1.bf16.msra.mxu0 %v522_v15 }
  0x2a   : > { %326 = vmatprep.subr.bf16.mxu0 %v523_v16 }
  0x2d   : > { %327 = vmatpush1.bf16.msra.mxu0 %v525_v17 }
  0x30   : > { %345 = vmatmul.mubr.bf16.vlgmr.msra.gmra.mxu0 %v209_v18 }
  0x89   : > { %v230_v19 = vpop.permute.xlu0 %229 }
  0xf0   : > { %v346_v20 = vpop.f32.mrf.mxu0 }
  0xf1   : > { %v347_v21 = vadd.f32 %v346_v20, %v230_v19 }
  0xf2   : > { %v348_v22 = vpop.f32.mrf.mxu0 }
  0xf3   : > { %v353_v23 = vmax.f32 %v347_v21, 0.0  ;;  %v349_v24 = vadd.f32 %v348_v22, %v230_v19 }
  0xf4   : > { %v350_v25 = vpop.f32.mrf.mxu0 }
  0xf5   : > { %355 = vst [vmem:[%s206_s27] sm:$0xff] %v353_v23  ;;  %v354_v26 = vmax.f32 %v349_v24, 0.0 }
  0xf6   : > { %v351_v27 = vpop.f32.mrf.mxu0 }
  0xf7   : > { %356 = vst [vmem:[%s206_s27 + $0x8] sm:$0xff] %v354_v26 }
  0xf8 PF: > { %s13_s14 = sadd.s32 1, %s548_s14   ;;  %s618_s12 = smov %s544_s13 }
  0xf9   : > { %p10_p5 = scmp.ge.s32.totalorder %s13_s14, 4   ;;  %s619_s13 = smov %s621_s15 }
  0xfb   :  { %12 = sbr.rel (!%p10_p5) target bundleno = 2 (0x2), region = 62 }

</bundles_post_ra>
